<compile_context>
chip_gen: v7x
topology: tpu7x:2x2x1
jax: 0.10.0
libtpu: 0.0.40
codegen_flags: <defaults>
</compile_context>

<pallas_src>
import functools
import math

import jax
import jax.numpy as jnp
from jax.experimental import pallas as pl
from jax.experimental.pallas import tpu as pltpu

_LANES = 128       # lane-dense last dim
_TILE_ROWS = 4096  # 4096 x 128 f32 = 2 MiB/buffer; 8 MiB double-buffered in+out


def _round_up(x, m):
    return ((x + m - 1) // m) * m


def _cdiv(a, b):
    return -(-a // b)


def _add_gaussian_noise_kernel(seed_ref, x_ref, o_ref, *, sigma, block_rows):
    """out = x + sigma * z, z ~ N(0,1) via sin-free Box-Muller on hashed counters."""
    half = block_rows // 2
    lanes = x_ref.shape[-1]

    # Unique global counter per Box-Muller *pair* (each pair yields 2 normals).
    row = jax.lax.broadcasted_iota(jnp.int32, (half, lanes), 0).astype(jnp.uint32)
    lane = jax.lax.broadcasted_iota(jnp.int32, (half, lanes), 1).astype(jnp.uint32)
    seed_mix = seed_ref[0].astype(jnp.uint32) * jnp.uint32(0x9E3779B9)
    tile_base = (pl.program_id(0) * (half * lanes)).astype(jnp.uint32)
    c = (seed_mix + tile_base) + row * jnp.uint32(lanes) + lane

    # lowbias32 finalizer -> b1; cheap 3-op extra mixing round -> b2.
    b1 = (c ^ (c >> 16)) * jnp.uint32(0x7FEB352D)
    b1 = (b1 ^ (b1 >> 15)) * jnp.uint32(0x846CA68B)
    b1 = b1 ^ (b1 >> 16)
    b2 = (b1 ^ (b1 >> 13)) * jnp.uint32(0x9E3779B9)
    b2 = b2 ^ (b2 >> 16)

    # Mantissa bitcast trick: top 23 random bits -> float in [1, 2).
    one_bits = jnp.uint32(0x3F800000)
    m1 = jax.lax.bitcast_convert_type((b1 >> 9) | one_bits, jnp.float32)
    m2 = jax.lax.bitcast_convert_type((b2 >> 9) | one_bits, jnp.float32)
    u1 = jnp.float32(2.0) - m1          # (0, 1]  -> safe for log
    u2 = m2 - jnp.float32(1.0)          # [0, 1)

    # Box-Muller without sin: |sin| = sqrt(1 - cos^2), sign from spare bit 0
    # of b1 (bit discarded by the >>9 above), materialized as +-1.0 via bitcast.
    r = jnp.sqrt(jnp.float32(-2.0) * jnp.log(u1))
    cth = jnp.cos(jnp.float32(2.0 * math.pi) * u2)
    sgn = jax.lax.bitcast_convert_type((b1 << 31) | one_bits, jnp.float32)
    sth = sgn * jnp.sqrt(jnp.maximum(jnp.float32(1.0) - cth * cth, jnp.float32(0.0)))

    s = jnp.float32(sigma)
    z1 = r * cth
    z2 = r * sth
    xa = x_ref[pl.ds(0, half), :].astype(jnp.float32)
    xb = x_ref[pl.ds(half, half), :].astype(jnp.float32)
    o_ref[pl.ds(0, half), :] = (xa + s * z1).astype(o_ref.dtype)
    o_ref[pl.ds(half, half), :] = (xb + s * z2).astype(o_ref.dtype)


def add_gaussian_noise(x, sigma, seed=0):
    """JAX/Pallas equivalent of AddGaussianNoise(sigma).forward(x).

    sigma is divided by 255.0, exactly like the PyTorch module's __init__.
    `seed` controls the noise draw (torch draws fresh randomness per forward;
    pass a different seed per call for the same behaviour).
    """
    eff_sigma = float(sigma) / 255.0
    orig_shape = x.shape
    orig_dtype = x.dtype
    # TODO(synk): integer inputs (e.g. uint8 images) would need round+clamp on
    # the store; torch's randn_like only supports float tensors, so floats only.

    # Flatten to a lane-dense (rows, 128) slab.
    flat = x.reshape(-1)
    n = flat.size
    pad = (-n) % _LANES
    if pad:
        # TODO(synk): a masked tail store would avoid this extra HBM round trip
        # for element counts that are not multiples of 128.
        flat = jnp.pad(flat, (0, pad))
    x2 = flat.reshape(-1, _LANES)
    rows = x2.shape[0]

    # Half-split stores must stay aligned to the native tile: (8,128) for
    # 32-bit dtypes, (16,128) for 16-bit -> block_rows multiple of 16 / 32.
    align = 32 if jnp.dtype(orig_dtype).itemsize == 2 else 16
    # Aim for >= 2 grid steps (v7x megacore sharding), cap at _TILE_ROWS.
    target = max(align, _round_up(_cdiv(rows, 2), align))
    block_rows = min(_TILE_ROWS, target)
    grid = (pl.cdiv(rows, block_rows),)

    seed_arr = jnp.array([seed], dtype=jnp.int32)

    out2 = pl.pallas_call(
        functools.partial(
            _add_gaussian_noise_kernel, sigma=eff_sigma, block_rows=block_rows
        ),
        out_shape=jax.ShapeDtypeStruct((rows, _LANES), orig_dtype),
        grid=grid,
        in_specs=[
            pl.BlockSpec(memory_space=pltpu.MemorySpace.SMEM),      # seed scalar
            pl.BlockSpec((block_rows, _LANES), lambda i: (i, 0)),   # x tile
        ],
        out_specs=pl.BlockSpec((block_rows, _LANES), lambda i: (i, 0)),
        compiler_params=pltpu.CompilerParams(
            dimension_semantics=("parallel",)
        ),
    )(seed_arr, x2)

    out = out2.reshape(-1)
    if pad:
        out = out[:n]
    return out.reshape(orig_shape)


if __name__ == "__main__":
    key = jax.random.PRNGKey(0)
    # Small NCHW image batch, consistent with a torchvision-style transform input.
    x = jax.random.normal(key, (2, 4, 16, 16), dtype=jnp.float32)

    sigma = 25.0  # module uses sigma / 255.0
    y = add_gaussian_noise(x, sigma, seed=0)
    y = jax.block_until_ready(y)

    assert y.shape == x.shape and y.dtype == x.dtype
    assert bool(jnp.all(jnp.isfinite(y)))
    # Sanity: noise magnitude should be on the order of sigma / 255.
    diff_std = float(jnp.std(y - x))
    assert 0.25 * (sigma / 255.0) < diff_std < 4.0 * (sigma / 255.0), diff_std

    print("KERNEL_OK")
</pallas_src>

<mosaic_0001>
module attributes {stable_mosaic.version = 11 : i64} {
  func.func @_add_gaussian_noise_kernel(%arg0: i32, %arg1: memref<1xi32, #tpu.memory_space<smem>>, %arg2: memref<16x128xf32, #tpu.memory_space<vmem>>, %arg3: memref<16x128xf32, #tpu.memory_space<vmem>>) attributes {dimension_semantics = [#tpu.dimension_semantics<parallel>], iteration_bounds = array<i64: 1>, scalar_prefetch = 0 : i64, scratch_operands = 0 : i64, tpu.core_type = #tpu.core_type<tc>, window_params = [{transform_indices = @transform_0, window_bounds = array<i64: 1>}, {transform_indices = @transform_1, window_bounds = array<i64: 16, 128>}, {transform_indices = @transform_2, window_bounds = array<i64: 16, 128>}]} {
    %0 = tpu.iota {dimensions = array<i32: 0>} : vector<8x128xi32>
    %1 = tpu.iota {dimensions = array<i32: 1>} : vector<8x128xi32>
    %c0 = arith.constant 0 : index
    %2 = memref.load %arg1[%c0] : memref<1xi32, #tpu.memory_space<smem>>
    %c-1640531527_i32 = arith.constant -1640531527 : i32
    %3 = arith.muli %2, %c-1640531527_i32 : i32
    %c1024_i32 = arith.constant 1024 : i32
    %4 = arith.muli %arg0, %c1024_i32 : i32
    %5 = arith.addi %3, %4 : i32
    %c128_i32 = arith.constant 128 : i32
    %6 = vector.broadcast %c128_i32 : i32 to vector<8x128xi32>
    %7 = arith.muli %0, %6 : vector<8x128xi32>
    %8 = vector.broadcast %5 : i32 to vector<8x128xi32>
    %9 = arith.addi %8, %7 : vector<8x128xi32>
    %10 = arith.addi %9, %1 : vector<8x128xi32>
    %c16_i32 = arith.constant 16 : i32
    %11 = vector.broadcast %c16_i32 : i32 to vector<8x128xi32>
    %12 = arith.shrui %10, %11 : vector<8x128xi32>
    %13 = arith.xori %10, %12 : vector<8x128xi32>
    %c2146121005_i32 = arith.constant 2146121005 : i32
    %14 = vector.broadcast %c2146121005_i32 : i32 to vector<8x128xi32>
    %15 = arith.muli %13, %14 : vector<8x128xi32>
    %c15_i32 = arith.constant 15 : i32
    %16 = vector.broadcast %c15_i32 : i32 to vector<8x128xi32>
    %17 = arith.shrui %15, %16 : vector<8x128xi32>
    %18 = arith.xori %15, %17 : vector<8x128xi32>
    %c-2073254261_i32 = arith.constant -2073254261 : i32
    %19 = vector.broadcast %c-2073254261_i32 : i32 to vector<8x128xi32>
    %20 = arith.muli %18, %19 : vector<8x128xi32>
    %c16_i32_0 = arith.constant 16 : i32
    %21 = vector.broadcast %c16_i32_0 : i32 to vector<8x128xi32>
    %22 = arith.shrui %20, %21 : vector<8x128xi32>
    %23 = arith.xori %20, %22 : vector<8x128xi32>
    %c13_i32 = arith.constant 13 : i32
    %24 = vector.broadcast %c13_i32 : i32 to vector<8x128xi32>
    %25 = arith.shrui %23, %24 : vector<8x128xi32>
    %26 = arith.xori %23, %25 : vector<8x128xi32>
    %c-1640531527_i32_1 = arith.constant -1640531527 : i32
    %27 = vector.broadcast %c-1640531527_i32_1 : i32 to vector<8x128xi32>
    %28 = arith.muli %26, %27 : vector<8x128xi32>
    %c16_i32_2 = arith.constant 16 : i32
    %29 = vector.broadcast %c16_i32_2 : i32 to vector<8x128xi32>
    %30 = arith.shrui %28, %29 : vector<8x128xi32>
    %31 = arith.xori %28, %30 : vector<8x128xi32>
    %c9_i32 = arith.constant 9 : i32
    %32 = vector.broadcast %c9_i32 : i32 to vector<8x128xi32>
    %33 = arith.shrui %23, %32 : vector<8x128xi32>
    %c1065353216_i32 = arith.constant 1065353216 : i32
    %34 = vector.broadcast %c1065353216_i32 : i32 to vector<8x128xi32>
    %35 = arith.ori %33, %34 : vector<8x128xi32>
    %36 = tpu.bitcast %35 : vector<8x128xi32> -> vector<8x128xf32>
    %c9_i32_3 = arith.constant 9 : i32
    %37 = vector.broadcast %c9_i32_3 : i32 to vector<8x128xi32>
    %38 = arith.shrui %31, %37 : vector<8x128xi32>
    %c1065353216_i32_4 = arith.constant 1065353216 : i32
    %39 = vector.broadcast %c1065353216_i32_4 : i32 to vector<8x128xi32>
    %40 = arith.ori %38, %39 : vector<8x128xi32>
    %41 = tpu.bitcast %40 : vector<8x128xi32> -> vector<8x128xf32>
    %cst = arith.constant 2.000000e+00 : f32
    %42 = vector.broadcast %cst : f32 to vector<8x128xf32>
    %43 = arith.subf %42, %36 : vector<8x128xf32>
    %cst_5 = arith.constant 1.000000e+00 : f32
    %44 = vector.broadcast %cst_5 : f32 to vector<8x128xf32>
    %45 = arith.subf %41, %44 : vector<8x128xf32>
    %46 = math.log %43 : vector<8x128xf32>
    %cst_6 = arith.constant -2.000000e+00 : f32
    %47 = vector.broadcast %cst_6 : f32 to vector<8x128xf32>
    %48 = arith.mulf %47, %46 : vector<8x128xf32>
    %49 = math.sqrt %48 : vector<8x128xf32>
    %cst_7 = arith.constant 6.28318548 : f32
    %50 = vector.broadcast %cst_7 : f32 to vector<8x128xf32>
    %51 = arith.mulf %50, %45 : vector<8x128xf32>
    %52 = math.cos %51 : vector<8x128xf32>
    %c31_i32 = arith.constant 31 : i32
    %53 = vector.broadcast %c31_i32 : i32 to vector<8x128xi32>
    %54 = arith.shli %23, %53 : vector<8x128xi32>
    %c1065353216_i32_8 = arith.constant 1065353216 : i32
    %55 = vector.broadcast %c1065353216_i32_8 : i32 to vector<8x128xi32>
    %56 = arith.ori %54, %55 : vector<8x128xi32>
    %57 = tpu.bitcast %56 : vector<8x128xi32> -> vector<8x128xf32>
    %58 = arith.mulf %52, %52 : vector<8x128xf32>
    %cst_9 = arith.constant 1.000000e+00 : f32
    %59 = vector.broadcast %cst_9 : f32 to vector<8x128xf32>
    %60 = arith.subf %59, %58 : vector<8x128xf32>
    %cst_10 = arith.constant 0.000000e+00 : f32
    %61 = vector.broadcast %cst_10 : f32 to vector<8x128xf32>
    %62 = arith.maximumf %60, %61 : vector<8x128xf32>
    %63 = math.sqrt %62 : vector<8x128xf32>
    %64 = arith.mulf %57, %63 : vector<8x128xf32>
    %65 = arith.mulf %49, %52 : vector<8x128xf32>
    %66 = arith.mulf %49, %64 : vector<8x128xf32>
    %c0_11 = arith.constant 0 : index
    %c0_12 = arith.constant 0 : index
    %67 = vector.load %arg2[%c0_11, %c0_12] : memref<16x128xf32, #tpu.memory_space<vmem>>, vector<8x128xf32>
    %c8 = arith.constant 8 : index
    %c0_13 = arith.constant 0 : index
    %68 = vector.load %arg2[%c8, %c0_13] : memref<16x128xf32, #tpu.memory_space<vmem>>, vector<8x128xf32>
    %cst_14 = arith.constant 0.0980392172 : f32
    %69 = vector.broadcast %cst_14 : f32 to vector<8x128xf32>
    %70 = arith.mulf %69, %65 : vector<8x128xf32>
    %71 = arith.addf %67, %70 : vector<8x128xf32>
    %c0_15 = arith.constant 0 : index
    %c0_16 = arith.constant 0 : index
    %72 = vector.load %arg3[%c0_15, %c0_16] : memref<16x128xf32, #tpu.memory_space<vmem>>, vector<8x128xf32>
    tpu.vector_store %arg3[%c0_15, %c0_16], %71 {strides = array<i32>} : memref<16x128xf32, #tpu.memory_space<vmem>>, vector<8x128xf32>,
    %cst_17 = arith.constant 0.0980392172 : f32
    %73 = vector.broadcast %cst_17 : f32 to vector<8x128xf32>
    %74 = arith.mulf %73, %66 : vector<8x128xf32>
    %75 = arith.addf %68, %74 : vector<8x128xf32>
    %c8_18 = arith.constant 8 : index
    %c0_19 = arith.constant 0 : index
    %76 = vector.load %arg3[%c8_18, %c0_19] : memref<16x128xf32, #tpu.memory_space<vmem>>, vector<8x128xf32>
    tpu.vector_store %arg3[%c8_18, %c0_19], %75 {strides = array<i32>} : memref<16x128xf32, #tpu.memory_space<vmem>>, vector<8x128xf32>,
    return
  }
  func.func @transform_0(%arg0: i32) -> i32 {
    %c0_i32 = arith.constant 0 : i32
    %c0_i32_0 = arith.constant 0 : i32
    return %c0_i32 : i32
  }
  func.func @transform_1(%arg0: i32) -> (i32, i32) {
    %c0_i32 = arith.constant 0 : i32
    %c0_i32_0 = arith.constant 0 : i32
    return %arg0, %c0_i32 : i32, i32
  }
  func.func @transform_2(%arg0: i32) -> (i32, i32) {
    %c0_i32 = arith.constant 0 : i32
    %c0_i32_0 = arith.constant 0 : i32
    return %arg0, %c0_i32 : i32, i32
  }
}

</mosaic_0001>

<bundles_post_ra>
// kernel: tpu_custom_call.1
= control target key start
LH: loop header
LB: loop body
LE: loop exit
PB: predicated region body
PF: predicated region fallthrough
CT: control target
= control target key end

     0   :  { %8 = vsyncpa [#allocation4], 0  ;;  %s377_s0 = inlined_call_operand.<no memory space> [shape: s32[1], index: 0, kind: input, shape index: {}]   ;;  %s378_s1 = inlined_call_operand.hbm [shape: f32[16,128], index: 1, kind: input, shape index: {}]   ;;  %s379_s2 = inlined_call_operand.hbm [shape: f32[16,128], index: 2, kind: output, shape index: {}]  }
   0x1   :  { %9 = vsyncpa [#allocation5], 0  ;;  %s292_s9 = smov [#allocation3]   ;;  %s244_s13 = scalar_lea.hbm %s378_s1, 256 }
   0x2   :  { %s17_s10 = sshll.u32 %s292_s9, 4  ;;  %p245_p0 = scmp.ne.s32.totalorder %s378_s1, %s244_s13  ;;  %s18_s10 = int_to_ptr.vmem [resolvable:$true] %s17_s10 }
   0x3   :  { %p248_p1 = scmp.lt.u32.totalorder %s244_s13, %s378_s1 }
   0x5   :  { %p250_p2 = pnand %p248_p1, %p245_p0 }
   0x7   :  { %253 = shalt.err (!%p250_p2)
}
   0x8   :  { %s254_s18 = scalar_lea.vmem %s18_s10, 256  ;;  %p259_p4 = scmp.lt.s32.totalorder %s18_s10, %s18_s10 }
   0x9   :  { %p255_p3 = scmp.ne.s32.totalorder %s18_s10, %s254_s18  ;;  %p260_p5 = scmp.lt.s32.totalorder %s254_s18, %s254_s18 }
   0xb   :  { %p261_p6 = por %p260_p5, %p259_p4 }
   0xd   :  { %p262_p7 = pnand %p261_p6, %p255_p3 }
   0xf   :  { %265 = shalt.err (!%p262_p7)
}
  0x10   :  { %s293_s19 = smov 128   ;;  %s294_s20 = smov 8  }
  0x11   :  { %23 = dma.hbm_to_vmem [thread:$0]  %s378_s1, 256, %s18_s10, [#allocation4], %s293_s19, %s293_s19, %s294_s20  }
  0x12   :  { %288 = dma.done.wait [#allocation4], 256  }
  0x13   :  { %289 = vsyncadd [#allocation4], 4294967040  ;;  %v27_v0 = vlaneseq  ;;  %s32_s25 = smul.u32 2654435769, %s377_s0  ;;  %v295_v34 = vmov 683565275  }
  0x14   :  { %v296_v36 = vmov 2475754826   ;;  %v297_v38 = vmov 2131351028   ;;  %v298_v40 = vmov 2102212464  }
  0x15   :  { %v28_v1 = vshrl.u32 %v27_v0, 7  ;;  %v36_v2 = vstv %s32_s25  ;;  %v30_v3 = vand.u32 127, %v27_v0  ;;  %v299_v42 = vmov 920167782   ;;  %s301_s0 = smov [#allocation6]  }
  0x16   :  { %v300_v50 = vmov 1326507024   ;;  %s203_s1 = sshll.u32 %s301_s0, 4  ;;  %s204_s1 = int_to_ptr.vmem [resolvable:$true] %s203_s1 }
  0x17   :  { %v35_v4 = vmul.u32 128, %v28_v1  ;;  %s266_s26 = scalar_lea.vmem %s204_s1, 256  ;;  %p271_p9 = scmp.lt.s32.totalorder %s204_s1, %s204_s1 }
  0x18   :  { %p267_p8 = scmp.ne.s32.totalorder %s204_s1, %s266_s26  ;;  %p272_p10 = scmp.lt.s32.totalorder %s266_s26, %s266_s26 }
  0x19   :  { %v37_v5 = vadd.s32 %v36_v2, %v35_v4 }
  0x1a   :  { %p273_p11 = por %p272_p10, %p271_p9 }
  0x1b   :  { %v38_v6 = vadd.s32 %v37_v5, %v30_v3 }
  0x1c   :  { %p274_p12 = pnand %p273_p11, %p267_p8 }
  0x1d   :  { %v39_v7 = vshrl.u32 %v38_v6, 16 }
  0x1f   :  { %v40_v8 = vxor.u32 %v39_v7, %v38_v6 }
  0x21   :  { %v41_v9 = vmul.u32 2146121005, %v40_v8 }
  0x23   :  { %v42_v10 = vshrl.u32 %v41_v9, 15 }
  0x25   :  { %v43_v11 = vxor.u32 %v42_v10, %v41_v9 }
  0x27   :  { %v44_v12 = vmul.u32 2221713035, %v43_v11 }
  0x29   :  { %v45_v13 = vshrl.u32 %v44_v12, 16 }
  0x2b   :  { %v335_v14 = vxor.u32 %v45_v13, %v44_v12 }
  0x2d   :  { %v47_v15 = vshrl.u32 %v335_v14, 13  ;;  %v52_v11 = vshrl.u32 %v335_v14, 9 }
  0x2f   :  { %v48_v16 = vxor.u32 %v47_v15, %v335_v14 }
  0x31   :  { %v49_v17 = vmul.u32 2654435769, %v48_v16  ;;  %v53_v16 = vor.u32 1065353216, %v52_v11 }
  0x33   :  { %v50_v18 = vshrl.u32 %v49_v17, 16 }
  0x35   :  { %v51_v19 = vxor.u32 %v50_v18, %v49_v17 }
  0x37   :  { %v55_v20 = vshrl.u32 %v51_v19, 9  ;;  %v58_v19 = vsub.f32 2.0, %v53_v16 }
  0x39   :  { %v56_v21 = vor.u32 1065353216, %v55_v20  ;;  %234 = vlog2.f32 %v58_v19 }
  0x3b   :  { %v215_v22 = vadd.f32 -1.0, %v56_v21 }
  0x3d   :  { %v339_v23 = vmul.f32 6.2831855, %v215_v22 }
  0x3f   :  { %v74_v24 = vand.u32 2139095040, %v339_v23  ;;  %v71_v27 = vand.u32 2147483647, %v339_v23  ;;  %vm73_vm7 = vcmp.lt.s32.totalorder %v339_v23, 0  ;;  %vm163_vm14 = vweird.f32 %v339_v23 }
  0x41   :  { %v75_v25 = vshrl.u32 %v74_v24, 23  ;;  %v78_v30 = vand.u32 8388607, %v71_v27  ;;  %vm72_vm8 = vcmp.le.f32.partialorder %v71_v27, 0.7853982 }
  0x43   :  { %v216_v26 = vadd.s32 4294967169, %v75_v25  ;;  %v79_v44 = vor.u32 8388608, %v78_v30 }
  0x45   :  { %v81_v28 = vadd.s32 1, %v216_v26  ;;  %v119_v59 = vshll.u32 %v79_v44, 8 }
  0x47   :  { %vm82_vm0 = vcmp.gt.s32.totalorder %v81_v28, 0 }
  0x48   :  { %v83_v29 = vsel %vm82_vm0, %v81_v28, 0 }
  0x49   :  { %v85_v31 = vand.u32 31, %v83_v29  ;;  %v84_v32 = vshrl.u32 %v83_v29, 5  ;;  %v235_v29 = vpop.eup %234 }
  0x4b   :  { %v86_v33 = vsub.s32 32, %v85_v31  ;;  %v88_v35 = vshll.u32 %v295_v34, %v85_v31  ;;  %v91_v37 = vshll.u32 %v296_v36, %v85_v31  ;;  %v94_v39 = vshll.u32 %v297_v38, %v85_v31 }
  0x4c   :  { %v97_v41 = vshll.u32 %v298_v40, %v85_v31  ;;  %v100_v43 = vshll.u32 %v299_v42, %v85_v31  ;;  %vm103_vm1 = vcmp.lt.s32.totalorder %v84_v32, 1  ;;  %vm106_vm2 = vcmp.lt.s32.totalorder %v84_v32, 4 }
  0x4d   :  { %v87_v45 = vshrl.u32 %v295_v34, %v86_v33  ;;  %v89_v46 = vshrl.u32 %v296_v36, %v86_v33  ;;  %v92_v47 = vshrl.u32 %v297_v38, %v86_v33  ;;  %v95_v48 = vshrl.u32 %v298_v40, %v86_v33 }
  0x4e   :  { %v98_v49 = vshrl.u32 %v299_v42, %v86_v33  ;;  %v101_v51 = vshrl.u32 %v300_v50, %v86_v33  ;;  %vm105_vm3 = vcmp.lt.s32.totalorder %v84_v32, 3  ;;  %vm104_vm4 = vcmp.lt.s32.totalorder %v84_v32, 2 }
  0x4f   :  { %v90_v52 = vor.u32 %v89_v46, %v88_v35  ;;  %v93_v53 = vor.u32 %v92_v47, %v91_v37  ;;  %v96_v54 = vor.u32 %v95_v48, %v94_v39  ;;  %v61_v34 = vmul.f32 0.6931472, %v235_v29 }
  0x50   :  { %v99_v55 = vor.u32 %v98_v49, %v97_v41  ;;  %v102_v56 = vor.u32 %v101_v51, %v100_v43 }
  0x51   :  { %v107_v57 = vsel %vm103_vm1, %v87_v45, %v90_v52  ;;  %v111_v58 = vsel %vm103_vm1, %v90_v52, %v93_v53  ;;  %v108_v60 = vsel %vm106_vm2, %v96_v54, 2102212464  ;;  %v115_v62 = vsel %vm103_vm1, %v93_v53, %v96_v54 }
  0x52   :  { %v112_v61 = vsel %vm106_vm2, %v99_v55, 920167782  ;;  %v116_v63 = vsel %vm106_vm2, %v102_v56, 1326507024  ;;  %v109_v0 = vsel %vm105_vm3, %v93_v53, %v108_v60  ;;  %v62_v39 = vmul.f32 -2.0, %v61_v34 }
  0x53   :  { %v113_v1 = vsel %vm105_vm3, %v96_v54, %v112_v61  ;;  %v117_v2 = vsel %vm105_vm3, %v99_v55, %v116_v63  ;;  %v110_v3 = vsel %vm104_vm4, %v107_v57, %v109_v0 }
  0x54   :  { %v114_v4 = vsel %vm104_vm4, %v111_v58, %v113_v1  ;;  %v118_v5 = vsel %vm104_vm4, %v115_v62, %v117_v2  ;;  %v126_v10 = vmul.u32 %v119_v59, %v110_v3  ;;  %236 = vrsqrt.f32 %v62_v39  ;;  %v190_v1 = vld [vmem:[#allocation3] sm:$0xff] }
  0x55   :  { %v345_v6 = vmul.u32.u64.low %v119_v59, %v118_v5  ;;  %v346_v7 = vmul.u32.u64.high %v119_v59, %v118_v5, %v345_v6  ;;  %v348_v8 = vmul.u32.u64.low %v119_v59, %v114_v4  ;;  %v349_v9 = vmul.u32.u64.high %v119_v59, %v114_v4, %v348_v8 }
  0x56   :  { %vm65_vm9 = vcmp.eq.f32.partialorder %v62_v39, inf  ;;  %v68_v54 = vand.u32 2147483648, %v62_v39  ;;  %vm67_vm11 = vcmp.eq.f32.partialorder %v62_v39, 0.0  ;;  %v174_v6 = vshll.u32 %v335_v14, 31 }
  0x57   :  { %vm128_vm5 = vc.u32 %v346_v7, %v348_v8  ;;  %v129_v12 = vadd.s32 1, %v349_v9  ;;  %v127_v28 = vadd.s32 %v348_v8, %v346_v7 }
  0x59   :  { %v130_v13 = vsel %vm128_vm5, %v129_v12, %v349_v9 }
  0x5a   :  { %v131_v15 = vadd.s32 %v130_v13, %v126_v10 }
  0x5c   :  { %v132_v17 = vadd.s32 536870912, %v131_v15 }
  0x5e   :  { %v133_v18 = vshrl.u32 %v132_v17, 30  ;;  %v237_v50 = vpop.eup %236 }
  0x5f   :  { %v64_v52 = vmul.f32 %v237_v50, %v62_v39 }
  0x60   :  { %v134_v20 = vshll.u32 %v133_v18, 30  ;;  %v157_v45 = vsub.s32 4, %v133_v18 }
  0x61   :  { %v66_v56 = vsel %vm65_vm9, %v62_v39, %v64_v52 }
  0x62   :  { %v135_v21 = vsub.s32 %v131_v15, %v134_v20  ;;  %v158_v48 = vsel %vm73_vm7, %v157_v45, %v133_v18  ;;  %v69_v59 = vsel %vm67_vm11, %v68_v54, %v66_v56  ;;  %v191_v15 = vld [vmem:[#allocation3 + $0x8] sm:$0xff] }
  0x63   :  { %v160_v49 = vsel %vm72_vm8, 0, %v158_v48 }
  0x64   :  { %v137_v22 = vsub.s32 0, %v135_v21  ;;  %v164_v51 = vand.u32 3, %v160_v49 }
  0x66   :  { %v217_v24 = vmin.u32 %v137_v22, %v135_v21  ;;  %vm169_vm10 = vcmp.eq.s32.totalorder %v164_v51, 2  ;;  %vm166_vm12 = vcmp.eq.s32.totalorder %v164_v51, 0  ;;  %vm165_vm13 = vcmp.lt.s32.totalorder %v164_v51, 2 }
  0x68   :  { %v139_v25 = vclz %v217_v24 }
  0x6a   :  { %v218_v26 = vadd.s32 4294967294, %v139_v25 }
  0x6c   :  { %vm219_vm6 = vcmp.lt.s32.totalorder %v218_v26, 0 }
  0x6d   :  { %v142_v30 = vsel %vm219_vm6, 0, %v218_v26 }
  0x6e   :  { %v143_v31 = vsub.s32 32, %v142_v30  ;;  %v144_v32 = vshll.u32 %v135_v21, %v142_v30  ;;  %v147_v33 = vsub.s32 4294967266, %v142_v30 }
  0x70   :  { %v145_v35 = vshrl.u32 %v127_v28, %v143_v31  ;;  %v148_v36 = vadd.s32 127, %v147_v33 }
  0x72   :  { %v146_v37 = vor.u32 %v145_v35, %v144_v32  ;;  %v149_v38 = vshll.u32 %v148_v36, 23 }
  0x74   :  { %v150_v40 = vor.u32 4788187, %v149_v38  ;;  %v153_v41 = vcvt.s32.f32 %v146_v37 }
  0x76   :  { %v151_v42 = vand.u32 2147483647, %v150_v40 }
  0x78   :  { %v154_v43 = vmul.f32 %v153_v41, %v151_v42 }
  0x7a   :  { %v155_v44 = vxor.u32 2147483648, %v154_v43 }
  0x7c   :  { %v156_v46 = vsel %vm73_vm7, %v155_v44, %v154_v43 }
  0x7d   :  { %v159_v47 = vsel %vm72_vm8, %v339_v23, %v156_v46  ;;  %v175_v23 = vor.u32 1065353216, %v174_v6 }
  0x7e   :  { %238 = vcosq.f32 %v159_v47 }
  0x7f   :  { %240 = vsinq.f32 %v159_v47 }
  0x88   :  { %v239_v53 = vpop.eup %238 }
  0x89   :  { %v241_v55 = vpop.eup %240  ;;  %v170_v27 = vxor.u32 2147483648, %v239_v53 }
  0x8a   :  { %v167_v57 = vxor.u32 2147483648, %v241_v55 }
  0x8b   :  { %v171_v58 = vsel %vm169_vm10, %v170_v27, %v241_v55 }
  0x8c   :  { %v168_v60 = vsel %vm166_vm12, %v239_v53, %v167_v57 }
  0x8d   :  { %v172_v61 = vsel %vm165_vm13, %v168_v60, %v171_v58 }
  0x8e   :  { %v173_v62 = vsel %vm163_vm14, nan, %v172_v61 }
  0x8f   :  { %v177_v63 = vmul.f32 %v173_v62, %v173_v62  ;;  %v188_v0 = vmul.f32 %v173_v62, %v69_v59 }
  0x91   :  { %v178_v2 = vsub.f32 1.0, %v177_v63  ;;  %v192_v3 = vmul.f32 0.09803922, %v188_v0 }
  0x93   :  { %v179_v4 = vmax.f32 %v178_v2, 0.0  ;;  %v193_v5 = vadd.f32 %v192_v3, %v190_v1 }
  0x95   :  { %194 = vst [vmem:[#allocation6] sm:$0xff] %v193_v5  ;;  %242 = vrsqrt.f32 %v179_v4  ;;  %vm182_vm15 = vcmp.eq.f32.partialorder %v179_v4, inf  ;;  %v185_v8 = vand.u32 2147483648, %v179_v4  ;;  %vm184_vm0 = vcmp.eq.f32.partialorder %v179_v4, 0.0 }
  0x9f   :  { %v243_v7 = vpop.eup %242 }
  0xa0   :  { %v181_v9 = vmul.f32 %v243_v7, %v179_v4 }
  0xa2   :  { %v183_v10 = vsel %vm182_vm15, %v179_v4, %v181_v9 }
  0xa3   :  { %v186_v11 = vsel %vm184_vm0, %v185_v8, %v183_v10 }
  0xa4   :  { %v187_v12 = vmul.f32 %v186_v11, %v175_v23 }
  0xa6   :  { %v189_v13 = vmul.f32 %v187_v12, %v69_v59 }
  0xa8   :  { %v195_v16 = vmul.f32 0.09803922, %v189_v13 }
  0xaa   :  { %v196_v17 = vadd.f32 %v195_v16, %v191_v15 }
  0xac   :  { %197 = vst [vmem:[#allocation6 + $0x8] sm:$0xff] %v196_v17 }
  0xad   :  { %277 = shalt.err (!%p274_p12)
}
  0xae   :  { %s278_s29 = scalar_lea.hbm %s379_s2, 256 }
  0xaf   :  { %p279_p13 = scmp.ne.s32.totalorder %s379_s2, %s278_s29  ;;  %p282_p0 = scmp.lt.u32.totalorder %s278_s29, %s379_s2 }
  0xb1   :  { %p284_p1 = pnand %p282_p0, %p279_p13 }
  0xb3   :  { %287 = shalt.err (!%p284_p1)
}
  0xb4   :  { %209 = dma.vmem_to_hbm [thread:$0]  %s204_s1, 256, %s379_s2, [#allocation5], %s293_s19, %s293_s19, %s294_s20  }
  0xb5   :  { %290 = dma.done.wait [#allocation5], 256  }
  0xb6   :  { %291 = vsyncadd [#allocation5], 4294967040 }
  0xb7   :  { %213 = vsyncpa [#allocation4], 1 }
  0xb8   :  { %214 = vsyncpa [#allocation5], 1 }

</bundles_post_ra>
